<compile_context>
chip_gen: v5e
topology: v5e:2x2
jax: 0.10.0
libtpu: 0.0.40
codegen_flags: <defaults>
</compile_context>

<pallas_src>
import functools

import jax
import jax.numpy as jnp
from jax.experimental import pallas as pl
from jax.experimental.pallas import tpu as pltpu


# ----------------------------------------------------------------------------
# tile helpers
# ----------------------------------------------------------------------------
def _pick_tile(dim, target, base):
    """Largest multiple of `base` <= target that divides dim, else the full dim."""
    if dim <= target:
        return dim
    t = (target // base) * base
    while t >= base:
        if dim % t == 0:
            return t
        t -= base
    return dim


# ----------------------------------------------------------------------------
# Tiled Linear (+optional tanh) kernel: grid=(M/tm, N/tn, K/tk)
# ----------------------------------------------------------------------------
def _linear_tiled_kernel(x_ref, w_ref, b_ref, o_ref, acc_ref, *, activation):
    k = pl.program_id(2)

    @pl.when(k == 0)
    def _():
        acc_ref[...] = jnp.zeros_like(acc_ref)

    acc_ref[...] += jnp.dot(x_ref[...], w_ref[...],
                            preferred_element_type=jnp.float32)

    @pl.when(k == pl.num_programs(2) - 1)
    def _():
        out = acc_ref[...] + b_ref[...].astype(jnp.float32)
        if activation == "tanh":
            out = jnp.tanh(out)          # f32 epilogue (EUP slot; safe on v5e too)
        o_ref[...] = out.astype(o_ref.dtype)


def linear_pallas(x, w, b, activation=None, *, tm=256, tn=256, tk=512):
    """y = act(x @ w + b). x:[M,K], w:[K,N], b:[N]. bf16 operands, f32 accumulate."""
    M, K = x.shape
    Kw, N = w.shape
    assert K == Kw, (K, Kw)
    # Lane-dense tiles: tm multiple of 8, tn/tk multiples of 128 (or full dim).
    # Sized to stay well under v7x's 64 MiB/TC VMEM with double-buffering.
    tm = _pick_tile(M, tm, 8)
    tn = _pick_tile(N, tn, 128)
    tk = _pick_tile(K, tk, 128)
    b2 = b.reshape(1, N)
    kernel = functools.partial(_linear_tiled_kernel, activation=activation)
    itemsize = jnp.dtype(x.dtype).itemsize
    cost = pl.CostEstimate(
        flops=2 * M * N * K,
        transcendentals=M * N if activation == "tanh" else 0,
        bytes_accessed=(M * K + K * N + N + M * N) * itemsize,
    )
    return pl.pallas_call(
        kernel,
        out_shape=jax.ShapeDtypeStruct((M, N), x.dtype),
        grid_spec=pltpu.PrefetchScalarGridSpec(
            num_scalar_prefetch=0,
            grid=(M // tm, N // tn, K // tk),
            in_specs=[
                pl.BlockSpec((tm, tk), lambda i, j, k: (i, k)),
                # constant in i -> weight tile reused across batch tiles (no re-DMA)
                pl.BlockSpec((tk, tn), lambda i, j, k: (k, j)),
                pl.BlockSpec((1, tn), lambda i, j, k: (0, j)),
            ],
            out_specs=pl.BlockSpec((tm, tn), lambda i, j, k: (i, j)),
            scratch_shapes=[pltpu.VMEM((tm, tn), jnp.float32)],
        ),
        compiler_params=pltpu.CompilerParams(
            dimension_semantics=("parallel", "parallel", "arbitrary")),
        cost_estimate=cost,
    )(x, w, b2)


# ----------------------------------------------------------------------------
# Fused Linear chain kernel: whole ordered_modules chain in one pallas_call,
# hidden activations stay in VMEM/vregs, grid only over batch tiles.
# ----------------------------------------------------------------------------
def _fused_mlp_kernel(*refs, activations, compute_dtype):
    n_layers = len(activations)
    x_ref = refs[0]
    o_ref = refs[-1]
    h = x_ref[...]
    for l in range(n_layers):
        w_ref = refs[1 + 2 * l]
        b_ref = refs[2 + 2 * l]
        acc = jnp.dot(h.astype(compute_dtype), w_ref[...],
                      preferred_element_type=jnp.float32)
        acc = acc + b_ref[...].astype(jnp.float32)
        if activations[l] == "tanh":
            acc = jnp.tanh(acc)
        h = acc  # kept in f32; re-cast to compute dtype only at the next matmul
    o_ref[...] = h.astype(o_ref.dtype)


def fused_mlp_pallas(x, layers, *, tm=256):
    M, d_in = x.shape
    tm = _pick_tile(M, tm, 8)
    d_out = layers[-1].w.shape[1]
    activations = tuple(l.activation for l in layers)
    compute_dtype = layers[0].w.dtype
    kernel = functools.partial(_fused_mlp_kernel, activations=activations,
                               compute_dtype=compute_dtype)

    in_specs = [pl.BlockSpec((tm, d_in), lambda i: (i, 0))]
    args = [x]
    flops = 0
    for l in layers:
        ki, ko = l.w.shape
        # block index constant in i -> weights/bias DMA'd once, resident across batch tiles
        in_specs.append(pl.BlockSpec((ki, ko), lambda i: (0, 0)))
        in_specs.append(pl.BlockSpec((1, ko), lambda i: (0, 0)))
        args.append(l.w)
        args.append(l.b.reshape(1, ko))
        flops += 2 * M * ki * ko

    return pl.pallas_call(
        kernel,
        out_shape=jax.ShapeDtypeStruct((M, d_out), x.dtype),
        grid_spec=pltpu.PrefetchScalarGridSpec(
            num_scalar_prefetch=0,
            grid=(M // tm,),
            in_specs=in_specs,
            out_specs=pl.BlockSpec((tm, d_out), lambda i: (i, 0)),
        ),
        compiler_params=pltpu.CompilerParams(
            dimension_semantics=("parallel",)),
        cost_estimate=pl.CostEstimate(flops=flops, transcendentals=M * d_out,
                                      bytes_accessed=sum(a.size * jnp.dtype(a.dtype).itemsize
                                                         for a in args)),
    )(*args)


# ----------------------------------------------------------------------------
# BaseModel equivalent (JAX / Pallas)
# ----------------------------------------------------------------------------
class LinearModule:
    """Pallas-backed equivalent of nn.Linear (+optional activation), bf16 params."""

    def __init__(self, key, d_in, d_out, activation=None, dtype=jnp.bfloat16):
        kw, kb = jax.random.split(key)
        bound = 1.0 / float(d_in) ** 0.5
        self.w = jax.random.uniform(kw, (d_in, d_out), jnp.float32,
                                    -bound, bound).astype(dtype)
        self.b = jax.random.uniform(kb, (d_out,), jnp.float32,
                                    -bound, bound).astype(dtype)
        self.activation = activation

    def __call__(self, x):
        return linear_pallas(x, self.w, self.b, self.activation)


# Fuse the chain only while its parameters comfortably fit in VMEM
# (v7x has 64 MiB/TC; leave ample headroom for activations + double buffers).
_FUSE_WEIGHT_BYTES = 8 << 20


class BaseModelPallas:
    """JAX/Pallas mirror of BaseModel: forward chains ordered_modules."""

    def __init__(self, n_train, sigma_b=1.0, sigma_w=1.0, sigma_default=1.0,
                 scale_sigma_w_by_dim=False, use_prior=False):
        self.n_train = n_train
        self.sigma_b = sigma_b
        self.sigma_w = sigma_w
        self.sigma_default = sigma_default
        self.scale_sigma_w_by_dim = scale_sigma_w_by_dim
        self.use_prior = use_prior
        self.ordered_modules = []  # mirrors nn.ModuleList() (empty in base class)
        # TODO(synk): init_prior_dist / log_prior / log_likelihood / loss / optimizer
        # are training-time probabilistic utilities with no forward-pass compute;
        # not translated to Pallas.

    def forward(self, x):
        if not self.ordered_modules:
            # exact base-class semantics: empty chain == identity. True no-op
            # (no HBM->VMEM->HBM copy kernel).
            return x
        if (all(isinstance(m, LinearModule) for m in self.ordered_modules)
                and sum(m.w.size * jnp.dtype(m.w.dtype).itemsize
                        + m.b.size * jnp.dtype(m.b.dtype).itemsize
                        for m in self.ordered_modules) <= _FUSE_WEIGHT_BYTES):
            # fused chain: one pallas_call, intermediates never touch HBM
            return fused_mlp_pallas(x, self.ordered_modules)
        # fallback: per-layer tiled kernels (large layers)
        for module in self.ordered_modules:
            x = module(x)
        return x

    def __call__(self, x):
        return self.forward(x)


# ----------------------------------------------------------------------------
# Demo / smoke test
# ----------------------------------------------------------------------------
if __name__ == "__main__":
    key = jax.random.PRNGKey(0)
    k_x, k_m1, k_m2, k_x2, k_m3 = jax.random.split(key, 5)

    # Lane-dense shapes: features multiples of 128, batch multiple of 16 (bf16 sublane pack).
    batch, d_in, hidden, d_out = 16, 128, 256, 128
    x = jax.random.normal(k_x, (batch, d_in), jnp.float32).astype(jnp.bfloat16)

    # 1) Exact base-class forward (empty ordered_modules) -> identity (no-op).
    model = BaseModelPallas(n_train=batch)
    y_id = model(x)
    jax.block_until_ready(y_id)
    assert y_id is x, "identity forward should be a no-op"

    # 2) Populated ordered_modules: fused Linear->tanh->Linear chain in one kernel.
    model.ordered_modules.append(LinearModule(k_m1, d_in, hidden, activation="tanh"))
    model.ordered_modules.append(LinearModule(k_m2, hidden, d_out, activation=None))
    y = model(x)
    jax.block_until_ready(y)
    assert y.shape == (batch, d_out) and y.dtype == x.dtype

    # reference (mimic bf16 operands / f32 accumulate of the kernel)
    ref = x
    for m in model.ordered_modules:
        ref = (ref.astype(jnp.float32) @ m.w.astype(jnp.float32)
               + m.b.astype(jnp.float32))
        if m.activation == "tanh":
            ref = jnp.tanh(ref)
    ref = ref.astype(x.dtype)
    assert bool(jnp.allclose(y.astype(jnp.float32), ref.astype(jnp.float32),
                             atol=2e-2, rtol=2e-2)), "fused chain mismatch"

    # 3) Exercise the grid-tiled K-reduction kernel directly (grid (2,2,2)).
    M2, K2, N2 = 256, 256, 256
    x2 = jax.random.normal(k_x2, (M2, K2), jnp.float32).astype(jnp.bfloat16)
    big = LinearModule(k_m3, K2, N2, activation="tanh")
    y2 = linear_pallas(x2, big.w, big.b, big.activation, tm=128, tn=128, tk=128)
    jax.block_until_ready(y2)
    ref2 = jnp.tanh(x2.astype(jnp.float32) @ big.w.astype(jnp.float32)
                    + big.b.astype(jnp.float32)).astype(x2.dtype)
    assert bool(jnp.allclose(y2.astype(jnp.float32), ref2.astype(jnp.float32),
                             atol=2e-2, rtol=2e-2)), "tiled linear mismatch"

    print("KERNEL_OK")
</pallas_src>

<mosaic_0001>
module attributes {stable_mosaic.version = 11 : i64} {
  func.func @_fused_mlp_kernel(%arg0: i32, %arg1: memref<16x128xbf16, #tpu.memory_space<vmem>>, %arg2: memref<128x256xbf16, #tpu.memory_space<vmem>>, %arg3: memref<1x256xbf16, #tpu.memory_space<vmem>>, %arg4: memref<256x128xbf16, #tpu.memory_space<vmem>>, %arg5: memref<1x128xbf16, #tpu.memory_space<vmem>>, %arg6: memref<16x128xbf16, #tpu.memory_space<vmem>>) attributes {dimension_semantics = [#tpu.dimension_semantics<parallel>], iteration_bounds = array<i64: 1>, scalar_prefetch = 0 : i64, scratch_operands = 0 : i64, tpu.core_type = #tpu.core_type<tc>, window_params = [{transform_indices = @transform_0, window_bounds = array<i64: 16, 128>}, {pipeline_mode = #tpu.pipeline_mode<synchronous>, transform_indices = @transform_1, window_bounds = array<i64: 128, 256>}, {pipeline_mode = #tpu.pipeline_mode<synchronous>, transform_indices = @transform_2, window_bounds = array<i64: 1, 256>}, {pipeline_mode = #tpu.pipeline_mode<synchronous>, transform_indices = @transform_3, window_bounds = array<i64: 256, 128>}, {pipeline_mode = #tpu.pipeline_mode<synchronous>, transform_indices = @transform_4, window_bounds = array<i64: 1, 128>}, {transform_indices = @transform_5, window_bounds = array<i64: 16, 128>}]} {
    %c0 = arith.constant 0 : index
    %c0_0 = arith.constant 0 : index
    %0 = vector.load %arg1[%c0, %c0_0] : memref<16x128xbf16, #tpu.memory_space<vmem>>, vector<16x128xbf16>
    %c0_1 = arith.constant 0 : index
    %c0_2 = arith.constant 0 : index
    %1 = vector.load %arg2[%c0_1, %c0_2] : memref<128x256xbf16, #tpu.memory_space<vmem>>, vector<128x256xbf16>
    %cst = arith.constant dense<0.000000e+00> : vector<16x256xf32>
    %2 = tpu.matmul %0, %1, %cst {dimension_numbers = #tpu.dot_dimension_numbers<[1], [0], [0], [1], [0, 0, 1, 1], [], []>} : vector<16x128xbf16>, vector<128x256xbf16>, vector<16x256xf32> -> vector<16x256xf32>
    %c0_3 = arith.constant 0 : index
    %c0_4 = arith.constant 0 : index
    %3 = vector.load %arg3[%c0_3, %c0_4] : memref<1x256xbf16, #tpu.memory_space<vmem>>, vector<1x256xbf16>
    %4 = arith.extf %3 : vector<1x256xbf16> to vector<1x256xf32>
    %5 = vector.broadcast %4 : vector<1x256xf32> to vector<16x256xf32>
    %6 = arith.addf %2, %5 : vector<16x256xf32>
    %7 = math.tanh %6 : vector<16x256xf32>
    %8 = arith.truncf %7 : vector<16x256xf32> to vector<16x256xbf16>
    %c0_5 = arith.constant 0 : index
    %c0_6 = arith.constant 0 : index
    %9 = vector.load %arg4[%c0_5, %c0_6] : memref<256x128xbf16, #tpu.memory_space<vmem>>, vector<256x128xbf16>
    %cst_7 = arith.constant dense<0.000000e+00> : vector<16x128xf32>
    %10 = tpu.matmul %8, %9, %cst_7 {dimension_numbers = #tpu.dot_dimension_numbers<[1], [0], [0], [1], [0, 0, 1, 1], [], []>} : vector<16x256xbf16>, vector<256x128xbf16>, vector<16x128xf32> -> vector<16x128xf32>
    %c0_8 = arith.constant 0 : index
    %c0_9 = arith.constant 0 : index
    %11 = vector.load %arg5[%c0_8, %c0_9] : memref<1x128xbf16, #tpu.memory_space<vmem>>, vector<1x128xbf16>
    %12 = arith.extf %11 : vector<1x128xbf16> to vector<1x128xf32>
    %13 = vector.broadcast %12 : vector<1x128xf32> to vector<16x128xf32>
    %14 = arith.addf %10, %13 : vector<16x128xf32>
    %15 = arith.truncf %14 : vector<16x128xf32> to vector<16x128xbf16>
    %c0_10 = arith.constant 0 : index
    %c0_11 = arith.constant 0 : index
    %16 = vector.load %arg6[%c0_10, %c0_11] : memref<16x128xbf16, #tpu.memory_space<vmem>>, vector<16x128xbf16>
    tpu.vector_store %arg6[%c0_10, %c0_11], %15 {strides = array<i32>} : memref<16x128xbf16, #tpu.memory_space<vmem>>, vector<16x128xbf16>,
    return
  }
  func.func @transform_0(%arg0: i32) -> (i32, i32) {
    %c0_i32 = arith.constant 0 : i32
    %c0_i32_0 = arith.constant 0 : i32
    return %arg0, %c0_i32 : i32, i32
  }
  func.func @transform_1(%arg0: i32) -> (i32, i32) {
    %c0_i32 = arith.constant 0 : i32
    %c0_i32_0 = arith.constant 0 : i32
    %c0_i32_1 = arith.constant 0 : i32
    return %c0_i32, %c0_i32_0 : i32, i32
  }
  func.func @transform_2(%arg0: i32) -> (i32, i32) {
    %c0_i32 = arith.constant 0 : i32
    %c0_i32_0 = arith.constant 0 : i32
    %c0_i32_1 = arith.constant 0 : i32
    return %c0_i32, %c0_i32_0 : i32, i32
  }
  func.func @transform_3(%arg0: i32) -> (i32, i32) {
    %c0_i32 = arith.constant 0 : i32
    %c0_i32_0 = arith.constant 0 : i32
    %c0_i32_1 = arith.constant 0 : i32
    return %c0_i32, %c0_i32_0 : i32, i32
  }
  func.func @transform_4(%arg0: i32) -> (i32, i32) {
    %c0_i32 = arith.constant 0 : i32
    %c0_i32_0 = arith.constant 0 : i32
    %c0_i32_1 = arith.constant 0 : i32
    return %c0_i32, %c0_i32_0 : i32, i32
  }
  func.func @transform_5(%arg0: i32) -> (i32, i32) {
    %c0_i32 = arith.constant 0 : i32
    %c0_i32_0 = arith.constant 0 : i32
    return %arg0, %c0_i32 : i32, i32
  }
}

</mosaic_0001>

<bundles_post_ra>
// kernel: tpu_custom_call.1
= control target key start
LH: loop header
LB: loop body
LE: loop exit
PB: predicated region body
PF: predicated region fallthrough
CT: control target
= control target key end

     0   :  { %10 = vsyncpa [#allocation3], 0  ;;  %s794_s0 = inlined_call_operand.hbm [shape: bf16[16,128], index: 0, kind: input, shape index: {}]   ;;  %s795_s1 = inlined_call_operand.hbm [shape: bf16[128,256], index: 1, kind: input, shape index: {}]   ;;  %s796_s2 = inlined_call_operand.hbm [shape: bf16[1,256], index: 2, kind: input, shape index: {}]   ;;  %s797_s3 = inlined_call_operand.hbm [shape: bf16[256,128], index: 3, kind: input, shape index: {}]   ;;  %s798_s4 = inlined_call_operand.vmem [shape: bf16[1,128], index: 4, kind: input, shape index: {}]   ;;  %s799_s5 = inlined_call_operand.hbm [shape: bf16[16,128], index: 5, kind: output, shape index: {}]  }
   0x1   :  { %11 = vsyncpa [#allocation6], 0 }
   0x2   :  { %12 = vsyncpa [#allocation9], 0  ;;  %s31_s20 = sshll.u32 %s795_s1, 4  ;;  %s32_s20 = int_to_ptr.hbm [resolvable:$true] %s31_s20 }
   0x3   :  { %13 = vsyncpa [#allocation4], 0  ;;  %s728_s21 = smov [#allocation5]   ;;  %s18_s25 = sshll.u32 %s794_s0, 4  ;;  %s19_s25 = int_to_ptr.hbm [resolvable:$true] %s18_s25 }
   0x4   :  { %s33_s22 = sshll.u32 %s728_s21, 4  ;;  %s729_s26 = smov 128   ;;  %s34_s22 = int_to_ptr.vmem [resolvable:$true] %s33_s22 }
   0x5   :  { %s730_s27 = smov 8   ;;  %s731_s28 = smov [#allocation2]  }
   0x6   :  { %39 = dma.hbm_to_vmem [thread:$0]  %s32_s20, 2048, %s34_s22, [#allocation6], %s729_s26, %s729_s26, %s730_s27  }
   0x7   :  { %s20_s29 = sshll.u32 %s731_s28, 4  ;;  %s732_s30 = smov 64   ;;  %s21_s29 = int_to_ptr.vmem [resolvable:$true] %s20_s29 }
   0x8   :  { %s733_s6 = smov 4   ;;  %s45_s8 = sshll.u32 %s796_s2, 4  ;;  %s46_s8 = int_to_ptr.hbm [resolvable:$true] %s45_s8 }
   0x9   :  { %26 = dma.hbm_to_vmem [thread:$0]  %s19_s25, 128, %s21_s29, [#allocation3], %s732_s30, %s732_s30, %s733_s6  }
   0xa   :  { %s734_s9 = smov [#allocation7]   ;;  %s55_s12 = sshll.u32 %s797_s3, 4  ;;  %s56_s12 = int_to_ptr.hbm [resolvable:$true] %s55_s12 }
   0xb   :  { %s47_s0 = sshll.u32 %s734_s9, 4  ;;  %s735_s13 = smov [#allocation8]   ;;  %s48_s0 = int_to_ptr.vmem [resolvable:$true] %s47_s0 }
   0xc   :  { %50 = dma.hbm_to_vmem [thread:$0]  %s46_s8, 32, %s48_s0, [#allocation6]  }
   0xd   :  { %s57_s14 = sshll.u32 %s735_s13, 4  ;;  %s58_s14 = int_to_ptr.vmem [resolvable:$true] %s57_s14 }
   0xe   :  { %63 = dma.hbm_to_vmem [thread:$0]  %s56_s12, 2048, %s58_s14, [#allocation9], %s732_s30, %s732_s30, %s733_s6  }
   0xf   :  { %720 = dma.done.wait [#allocation3], 128  }
  0x10   :  { %721 = vsyncadd [#allocation3], 4294967168 }
  0x11   :  { %722 = dma.done.wait [#allocation6], 2080  }
  0x12   :  { %723 = vsyncadd [#allocation6], 4294965216 }
  0x13   :  { %724 = dma.done.wait [#allocation9], 2048  }
  0x14   :  { %725 = vsyncadd [#allocation9], 4294965248  ;;  %v475_v0 = vld [vmem:[#allocation5 + $0x70] sm:$0xf]  ;;  %v561_v1 = vld [vmem:[#allocation5 + $0x74] sm:$0xf0] }
  0x15   :  { %v560_v2 = vld [vmem:[#allocation5 + $0x74] sm:$0xf]  ;;  %v476_v3 = vor.u32 %v561_v1, %v475_v0  ;;  %v477_v4 = vld [vmem:[#allocation5 + $0x78] sm:$0xf0]  ;;  %v467_v5 = vld [vmem:[#allocation5 + $0x60] sm:$0xf] }
  0x16   :  { %v559_v6 = vld [vmem:[#allocation5 + $0x64] sm:$0xf0]  ;;  %v480_v7 = vor.u32 %v560_v2, %v477_v4  ;;  %v558_v8 = vld [vmem:[#allocation5 + $0x64] sm:$0xf]  ;;  %v469_v9 = vld [vmem:[#allocation5 + $0x68] sm:$0xf0] }
  0x17   :  { %195 = vmatpush.bf16.msra.mxu0 %v476_v3  ;;  %v468_v10 = vor.u32 %v559_v6, %v467_v5  ;;  %v472_v11 = vor.u32 %v558_v8, %v469_v9  ;;  %v459_v12 = vld [vmem:[#allocation5 + $0x50] sm:$0xf]  ;;  %v557_v13 = vld [vmem:[#allocation5 + $0x54] sm:$0xf0]  ;;  %v556_v14 = vld [vmem:[#allocation5 + $0x54] sm:$0xf] }
  0x18   :  { %209 = vmatpush.bf16.msra.mxu1 %v480_v7  ;;  %v461_v15 = vld [vmem:[#allocation5 + $0x58] sm:$0xf0]  ;;  %v460_v16 = vor.u32 %v557_v13, %v459_v12  ;;  %v451_v18 = vld [vmem:[#allocation5 + $0x40] sm:$0xf]  ;;  %v555_v19 = vld [vmem:[#allocation5 + $0x44] sm:$0xf0] }
  0x19   :  { %v464_v17 = vor.u32 %v556_v14, %v461_v15  ;;  %v554_v20 = vld [vmem:[#allocation5 + $0x44] sm:$0xf]  ;;  %v453_v21 = vld [vmem:[#allocation5 + $0x48] sm:$0xf0]  ;;  %v452_v22 = vor.u32 %v555_v19, %v451_v18  ;;  %v569_v23 = vld [vmem:[#allocation8 + $0x38] sm:$0xff]  ;;  %s736_s15 = smov [#allocation10]  }
  0x1a   :  { %v577_v24 = vld [vmem:[#allocation8 + $0x78] sm:$0xff]  ;;  %v456_v25 = vor.u32 %v554_v20, %v453_v21  ;;  %v443_v26 = vld [vmem:[#allocation5 + $0x30] sm:$0xf]  ;;  %v552_v28 = vld [vmem:[#allocation5 + $0x34] sm:$0xf]  ;;  %360 = vmatpush.bf16.msra.mxu2 %v569_v23  ;;  %s396_s16 = sshll.u32 %s736_s15, 4  ;;  %s397_s16 = int_to_ptr.vmem [resolvable:$true] %s396_s16 }
  0x1b   :  { %196 = vmatpush.bf16.msra.mxu0 %v468_v10  ;;  %v553_v27 = vld [vmem:[#allocation5 + $0x34] sm:$0xf0]  ;;  %v445_v29 = vld [vmem:[#allocation5 + $0x38] sm:$0xf0]  ;;  %374 = vmatpush.bf16.msra.mxu3 %v577_v24  ;;  %v435_v34 = vld [vmem:[#allocation5 + $0x20] sm:$0xf] }
  0x1c   :  { %210 = vmatpush.bf16.msra.mxu1 %v472_v11  ;;  %v568_v30 = vld [vmem:[#allocation8 + $0x30] sm:$0xff]  ;;  %v444_v32 = vor.u32 %v553_v27, %v443_v26  ;;  %v448_v33 = vor.u32 %v552_v28, %v445_v29  ;;  %v551_v35 = vld [vmem:[#allocation5 + $0x24] sm:$0xf0]  ;;  %v550_v36 = vld [vmem:[#allocation5 + $0x24] sm:$0xf]  ;;  %s398_s19 = sshll.u32 %s799_s5, 4  ;;  %s399_s19 = int_to_ptr.hbm [resolvable:$true] %s398_s19 }
  0x1d   :  { %v576_v31 = vld [vmem:[#allocation8 + $0x70] sm:$0xff]  ;;  %v437_v37 = vld [vmem:[#allocation5 + $0x28] sm:$0xf0]  ;;  %v436_v40 = vor.u32 %v551_v35, %v435_v34  ;;  %v429_v45 = vld [vmem:[#allocation5 + $0x18] sm:$0xf0] }
  0x1e   :  { %361 = vmatpush.bf16.msra.mxu2 %v568_v30  ;;  %v567_v38 = vld [vmem:[#allocation8 + $0x28] sm:$0xff]  ;;  %v440_v41 = vor.u32 %v550_v36, %v437_v37  ;;  %v549_v43 = vld [vmem:[#allocation5 + $0x14] sm:$0xf0]  ;;  %v548_v44 = vld [vmem:[#allocation5 + $0x14] sm:$0xf] }
  0x1f   :  { %197 = vmatpush.bf16.msra.mxu0 %v460_v16  ;;  %375 = vmatpush.bf16.msra.mxu3 %v576_v31  ;;  %v575_v39 = vld [vmem:[#allocation8 + $0x68] sm:$0xff]  ;;  %v432_v47 = vor.u32 %v548_v44, %v429_v45  ;;  %v419_v48 = vld [vmem:[#allocation5] sm:$0xf]  ;;  %v546_v50 = vld [vmem:[#allocation5 + $0x4] sm:$0xf] }
  0x20   :  { %211 = vmatpush.bf16.msra.mxu1 %v464_v17  ;;  %v427_v42 = vld [vmem:[#allocation5 + $0x10] sm:$0xf]  ;;  %v547_v49 = vld [vmem:[#allocation5 + $0x4] sm:$0xf0]  ;;  %v421_v51 = vld [vmem:[#allocation5 + $0x8] sm:$0xf0] }
  0x21   :  { %v428_v46 = vor.u32 %v549_v43, %v427_v42  ;;  %v420_v52 = vor.u32 %v547_v49, %v419_v48  ;;  %v424_v53 = vor.u32 %v546_v50, %v421_v51  ;;  %v545_v54 = vld [vmem:[#allocation2] sm:$0xff]  ;;  %v566_v55 = vld [vmem:[#allocation8 + $0x20] sm:$0xff]  ;;  %v563_v61 = vld [vmem:[#allocation8 + $0x8] sm:$0xff] }
  0x22   :  { %362 = vmatpush.bf16.msra.mxu2 %v567_v38  ;;  %v574_v56 = vld [vmem:[#allocation8 + $0x60] sm:$0xff]  ;;  %v565_v57 = vld [vmem:[#allocation8 + $0x18] sm:$0xff]  ;;  %v564_v59 = vld [vmem:[#allocation8 + $0x10] sm:$0xff] }
  0x23   :  { %198 = vmatpush.bf16.msra.mxu0 %v452_v22  ;;  %376 = vmatpush.bf16.msra.mxu3 %v575_v39  ;;  %v573_v58 = vld [vmem:[#allocation8 + $0x58] sm:$0xff]  ;;  %v572_v60 = vld [vmem:[#allocation8 + $0x50] sm:$0xff]  ;;  %v571_v62 = vld [vmem:[#allocation8 + $0x48] sm:$0xff] }
  0x24   :  { %212 = vmatpush.bf16.msra.mxu1 %v456_v25  ;;  %v562_v63 = vld [vmem:[#allocation8] sm:$0xff]  ;;  %v100_v1 = vld [vmem:[#allocation7] sm:$0x3]  ;;  %v261_v21 = vld [vmem:[%s798_s4] sm:$0x1] }
  0x25   :  { %v570_v0 = vld [vmem:[#allocation8 + $0x40] sm:$0xff]  ;;  %v101_v2 = vunpack.c.l.bf16 %v100_v1  ;;  %v262_v22 = vunpack.c.l.bf16 %v261_v21 }
  0x26   :  { %363 = vmatpush.bf16.msra.mxu2 %v566_v55 }
  0x27   :  { %199 = vmatpush.bf16.msra.mxu0 %v444_v32  ;;  %377 = vmatpush.bf16.msra.mxu3 %v574_v56  ;;  %v103_v3 = vperm.slane %v101_v2, 0  ;;  %v104_v4 = vperm.slane %v101_v2, 2  ;;  %v263_v25 = vperm.slane %v262_v22, 0 }
  0x28   :  { %213 = vmatpush.bf16.msra.mxu1 %v448_v33 }
  0x29   :  { %v107_v6 = vperm.slane %v103_v3, 0  ;;  %v108_v8 = vperm.slane %v104_v4, 0 }
  0x2a   :  { %364 = vmatpush.bf16.msra.mxu2 %v565_v57 }
  0x2b   :  { %200 = vmatpush.bf16.msra.mxu0 %v436_v40  ;;  %378 = vmatpush.bf16.msra.mxu3 %v573_v58 }
  0x2c   :  { %214 = vmatpush.bf16.msra.mxu1 %v440_v41 }
  0x2e   :  { %365 = vmatpush.bf16.msra.mxu2 %v564_v59 }
  0x2f   :  { %201 = vmatpush.bf16.msra.mxu0 %v428_v46  ;;  %379 = vmatpush.bf16.msra.mxu3 %v572_v60 }
  0x30   :  { %215 = vmatpush.bf16.msra.mxu1 %v432_v47 }
  0x32   :  { %366 = vmatpush.bf16.msra.mxu2 %v563_v61 }
  0x33   :  { %202 = vmatpush.bf16.msra.mxu0 %v420_v52  ;;  %380 = vmatpush.bf16.msra.mxu3 %v571_v62 }
  0x34   :  { %216 = vmatpush.bf16.msra.mxu1 %v424_v53 }
  0x36   :  { %203 = vmatmul.bf16.vlgmr.msra.gmra.mxu0 %v545_v54  ;;  %367 = vmatpush.bf16.msra.mxu2 %v562_v63 }
  0x37   :  { %217 = vmatmul.bf16.vlgmr.msra.gmra.mxu1 %v545_v54  ;;  %381 = vmatpush.bf16.msra.mxu3 %v570_v0 }
  0xb3   :  { %v204_v5 = vpop.f32.mrf.mxu0 }
  0xb4   :  { %v218_v7 = vpop.f32.mrf.mxu1  ;;  %v205_v9 = vadd.f32 %v204_v5, %v107_v6 }
  0xb5   :  { %v219_v10 = vadd.f32 %v218_v7, %v108_v8 }
  0xb6   :  { %592 = vtanh.f32 %v205_v9 }
  0xb7   :  { %594 = vtanh.f32 %v219_v10 }
  0xbb   :  { %v206_v11 = vpop.f32.mrf.mxu0 }
  0xbc   :  { %v207_v12 = vadd.f32 %v206_v11, %v107_v6  ;;  %v220_v13 = vpop.f32.mrf.mxu1  ;;  %v593_v15 = vpop.eup %592 }
  0xbd   :  { %v221_v14 = vadd.f32 %v220_v13, %v108_v8  ;;  %v595_v16 = vpop.eup %594 }
  0xbe   :  { %596 = vtanh.f32 %v207_v12 }
  0xbf   :  { %598 = vtanh.f32 %v221_v14 }
  0xc4   :  { %v597_v17 = vpop.eup %596 }
  0xc5   :  { %v599_v18 = vpop.eup %598  ;;  %v227_v19 = vpack.c.bf16 %v597_v17, %v593_v15 }
  0xc6   :  { %v228_v20 = vpack.c.bf16 %v599_v18, %v595_v16 }
  0xc7   :  { %368 = vmatmul.bf16.vlgmr.msra.gmra.mxu2 %v227_v19 }
  0xc8   :  { %382 = vmatmul.bf16.vlgmr.msra.gmra.mxu3 %v228_v20 }
 0x14a   :  { %v369_v23 = vpop.f32.mrf.mxu2 }
 0x14b   :  { %v383_v24 = vpop.f32.mrf.mxu3  ;;  %v370_v26 = vadd.f32 %v369_v23, %v263_v25 }
 0x14d   :  { %v384_v30 = vadd.f32 %v383_v24, %v370_v26 }
 0x152   :  { %v371_v27 = vpop.f32.mrf.mxu2 }
 0x153   :  { %v372_v28 = vadd.f32 %v371_v27, %v263_v25  ;;  %v385_v29 = vpop.f32.mrf.mxu3 }
 0x155   :  { %v386_v31 = vadd.f32 %v385_v29, %v372_v28 }
 0x157   :  { %v581_v32 = vpack.c.bf16 %v386_v31, %v384_v30 }
 0x159   :  { %582 = vst [vmem:[#allocation10] sm:$0xff] %v581_v32  }
 0x15a   :  { %404 = dma.vmem_to_hbm [thread:$0]  %s397_s16, 128, %s399_s19, [#allocation4], %s732_s30, %s732_s30, %s733_s6  }
 0x15b   :  { %726 = dma.done.wait [#allocation4], 128  }
 0x15c   :  { %727 = vsyncadd [#allocation4], 4294967168 }
 0x15d   :  { %409 = vsyncpa [#allocation3], 1 }
 0x15e   :  { %410 = vsyncpa [#allocation6], 1 }
 0x15f   :  { %411 = vsyncpa [#allocation9], 1 }
 0x160   :  { %412 = vsyncpa [#allocation4], 1 }

</bundles_post_ra>
